<compile_context>
chip_gen: v6e
topology: v6e:2x2x1
jax: 0.10.0
libtpu: 0.0.40
codegen_flags: <defaults>
</compile_context>

<pallas_src>
import jax
import jax.numpy as jnp
from jax.experimental import pallas as pl
from jax.experimental.pallas import tpu as pltpu


def _round_up(n, m):
    return ((n + m - 1) // m) * m


def mlp_kernel(x_ref, w1_ref, b1_ref, wo_ref, bo_ref, out_ref):
    # Cast activations to bf16 in-kernel (hides under DMA); f32 MXU accumulate.
    x_bf = x_ref[...].astype(jnp.bfloat16)
    h = jnp.dot(x_bf, w1_ref[...], preferred_element_type=jnp.float32)
    h = jnp.maximum(h + b1_ref[...], 0.0)            # bias + ReLU in f32 (VPU)
    o = jnp.dot(h.astype(jnp.bfloat16), wo_ref[...],
                preferred_element_type=jnp.float32)
    out_ref[...] = (o + bo_ref[...]).astype(out_ref.dtype)


def classification_mlp_forward(x, w1, b1, wo, bo, *, block_b=1024):
    B, Din = x.shape
    H = w1.shape[1]
    O = wo.shape[1]

    # Weights -> bf16 (tiny, one-time); biases stay f32; x stays f32 (cast
    # happens inside the kernel to avoid an extra HBM pass).
    w1_bf = w1.astype(jnp.bfloat16)
    wo_bf = wo.astype(jnp.bfloat16)
    b1_f = b1.astype(jnp.float32)
    bo_f = bo.astype(jnp.float32)

    # Batch tile: large enough to amortize per-step overhead, 16-aligned
    # (bf16 sublane packing), capped so the grid keeps >= ~4 steps
    # (>= 2 per v7x TensorCore for megacore sharding + pipeline overlap).
    tb = max(16, min(block_b, _round_up(pl.cdiv(B, 4), 16)))
    grid = (pl.cdiv(B, tb),)

    flops = 2 * B * (Din * H + H * O)
    bytes_accessed = (B * Din * 4                # x (f32, read once)
                      + Din * H * 2 + H * O * 2  # weights (bf16)
                      + H * 4 + O * 4            # biases (f32)
                      + B * O * 4)               # output (f32)

    out = pl.pallas_call(
        mlp_kernel,
        out_shape=jax.ShapeDtypeStruct((B, O), jnp.float32),
        grid_spec=pltpu.PrefetchScalarGridSpec(
            num_scalar_prefetch=0,
            grid=grid,
            in_specs=[
                # x: streamed one batch tile per grid step (double-buffered).
                pl.BlockSpec((tb, Din), lambda i: (i, 0)),
                # Weights / biases: constant block index -> DMA'd once,
                # single-buffered, VMEM-resident for the whole grid.
                pl.BlockSpec((Din, H), lambda i: (0, 0),
                             pipeline_mode=pl.Buffered(1)),
                pl.BlockSpec((1, H), lambda i: (0, 0),
                             pipeline_mode=pl.Buffered(1)),
                pl.BlockSpec((H, O), lambda i: (0, 0),
                             pipeline_mode=pl.Buffered(1)),
                pl.BlockSpec((1, O), lambda i: (0, 0),
                             pipeline_mode=pl.Buffered(1)),
            ],
            out_specs=pl.BlockSpec((tb, O), lambda i: (i, 0)),
        ),
        compiler_params=pltpu.CompilerParams(
            # Batch tiles are independent -> shard across v7x's 2 TCs.
            dimension_semantics=("parallel",),
        ),
        cost_estimate=pl.CostEstimate(
            flops=flops, transcendentals=0, bytes_accessed=bytes_accessed),
    )(x, w1_bf, b1_f, wo_bf, bo_f)

    # torch's .squeeze(1) is a no-op unless output_dims == 1
    if out.shape[1] == 1:
        out = jnp.squeeze(out, axis=1)
    return out


def init_linear_params(key, fan_in, fan_out):
    # PyTorch nn.Linear default init: U(-1/sqrt(fan_in), 1/sqrt(fan_in))
    kw, kb = jax.random.split(key)
    bound = 1.0 / (fan_in ** 0.5)
    w = jax.random.uniform(kw, (fan_in, fan_out), jnp.float32, -bound, bound)
    b = jax.random.uniform(kb, (1, fan_out), jnp.float32, -bound, bound)
    return w, b


if __name__ == "__main__":
    # Small shapes consistent with the module's forward:
    # x: (batch, input_dims); classification head with output_dims classes.
    # batch=256 -> tb=64, grid of 4 independent batch tiles.
    batch, input_dims, hidden_dims, output_dims = 256, 32, 32, 8

    key = jax.random.PRNGKey(0)
    kx, k1, k2, k3 = jax.random.split(key, 4)

    x = jax.random.normal(kx, (batch, input_dims), jnp.float32)

    w1, b1 = init_linear_params(k1, input_dims, hidden_dims)     # linear1
    w2, b2 = init_linear_params(k2, hidden_dims, hidden_dims)    # linear2 (unused in forward)
    wo, bo = init_linear_params(k3, hidden_dims, output_dims)    # output

    out = classification_mlp_forward(x, w1, b1, wo, bo)
    out = jax.block_until_ready(out)
    assert out.shape == (batch, output_dims)

    # Reference 1: same bf16-operand / f32-accumulation math as the kernel.
    h_ref = jnp.maximum(
        jnp.dot(x.astype(jnp.bfloat16), w1.astype(jnp.bfloat16),
                preferred_element_type=jnp.float32) + b1, 0.0)
    ref_bf = jnp.dot(h_ref.astype(jnp.bfloat16), wo.astype(jnp.bfloat16),
                     preferred_element_type=jnp.float32) + bo
    # Reference 2: full f32 PyTorch-forward semantics (loose tolerance for bf16).
    ref_f32 = jnp.maximum(x @ w1 + b1, 0.0) @ wo + bo

    assert jnp.allclose(out, ref_bf, atol=2e-3, rtol=2e-3)
    assert jnp.allclose(out, ref_f32, atol=5e-2, rtol=5e-2)

    print("KERNEL_OK")
</pallas_src>

<mosaic_0001>
module attributes {stable_mosaic.version = 11 : i64} {
  func.func @mlp_kernel(%arg0: i32, %arg1: memref<64x32xf32, #tpu.memory_space<vmem>>, %arg2: memref<32x32xbf16, #tpu.memory_space<vmem>>, %arg3: memref<1x32xf32, #tpu.memory_space<vmem>>, %arg4: memref<32x8xbf16, #tpu.memory_space<vmem>>, %arg5: memref<1x8xf32, #tpu.memory_space<vmem>>, %arg6: memref<64x8xf32, #tpu.memory_space<vmem>>) attributes {dimension_semantics = [#tpu.dimension_semantics<parallel>], iteration_bounds = array<i64: 4>, scalar_prefetch = 0 : i64, scratch_operands = 0 : i64, tpu.core_type = #tpu.core_type<tc>, window_params = [{transform_indices = @transform_0, window_bounds = array<i64: 64, 32>}, {pipeline_mode = #tpu.pipeline_mode<synchronous>, transform_indices = @transform_1, window_bounds = array<i64: 32, 32>}, {pipeline_mode = #tpu.pipeline_mode<synchronous>, transform_indices = @transform_2, window_bounds = array<i64: 1, 32>}, {pipeline_mode = #tpu.pipeline_mode<synchronous>, transform_indices = @transform_3, window_bounds = array<i64: 32, 8>}, {pipeline_mode = #tpu.pipeline_mode<synchronous>, transform_indices = @transform_4, window_bounds = array<i64: 1, 8>}, {transform_indices = @transform_5, window_bounds = array<i64: 64, 8>}]} {
    %c0 = arith.constant 0 : index
    %c0_0 = arith.constant 0 : index
    %0 = vector.load %arg1[%c0, %c0_0] : memref<64x32xf32, #tpu.memory_space<vmem>>, vector<64x32xf32>
    %1 = arith.truncf %0 : vector<64x32xf32> to vector<64x32xbf16>
    %c0_1 = arith.constant 0 : index
    %c0_2 = arith.constant 0 : index
    %2 = vector.load %arg2[%c0_1, %c0_2] : memref<32x32xbf16, #tpu.memory_space<vmem>>, vector<32x32xbf16>
    %cst = arith.constant dense<0.000000e+00> : vector<64x32xf32>
    %3 = tpu.matmul %1, %2, %cst {dimension_numbers = #tpu.dot_dimension_numbers<[1], [0], [0], [1], [0, 0, 1, 1], [], []>} : vector<64x32xbf16>, vector<32x32xbf16>, vector<64x32xf32> -> vector<64x32xf32>
    %c0_3 = arith.constant 0 : index
    %c0_4 = arith.constant 0 : index
    %4 = vector.load %arg3[%c0_3, %c0_4] : memref<1x32xf32, #tpu.memory_space<vmem>>, vector<1x32xf32>
    %5 = vector.broadcast %4 : vector<1x32xf32> to vector<64x32xf32>
    %6 = arith.addf %3, %5 : vector<64x32xf32>
    %cst_5 = arith.constant 0.000000e+00 : f32
    %7 = vector.broadcast %cst_5 : f32 to vector<64x32xf32>
    %8 = arith.maximumf %6, %7 : vector<64x32xf32>
    %9 = arith.truncf %8 : vector<64x32xf32> to vector<64x32xbf16>
    %c0_6 = arith.constant 0 : index
    %c0_7 = arith.constant 0 : index
    %10 = vector.load %arg4[%c0_6, %c0_7] : memref<32x8xbf16, #tpu.memory_space<vmem>>, vector<32x8xbf16>
    %cst_8 = arith.constant dense<0.000000e+00> : vector<64x8xf32>
    %11 = tpu.matmul %9, %10, %cst_8 {dimension_numbers = #tpu.dot_dimension_numbers<[1], [0], [0], [1], [0, 0, 1, 1], [], []>} : vector<64x32xbf16>, vector<32x8xbf16>, vector<64x8xf32> -> vector<64x8xf32>
    %c0_9 = arith.constant 0 : index
    %c0_10 = arith.constant 0 : index
    %12 = vector.load %arg5[%c0_9, %c0_10] : memref<1x8xf32, #tpu.memory_space<vmem>>, vector<1x8xf32>
    %13 = vector.broadcast %12 : vector<1x8xf32> to vector<64x8xf32>
    %14 = arith.addf %11, %13 : vector<64x8xf32>
    %c0_11 = arith.constant 0 : index
    %c0_12 = arith.constant 0 : index
    %15 = vector.load %arg6[%c0_11, %c0_12] : memref<64x8xf32, #tpu.memory_space<vmem>>, vector<64x8xf32>
    tpu.vector_store %arg6[%c0_11, %c0_12], %14 {strides = array<i32>} : memref<64x8xf32, #tpu.memory_space<vmem>>, vector<64x8xf32>,
    return
  }
  func.func @transform_0(%arg0: i32) -> (i32, i32) {
    %c0_i32 = arith.constant 0 : i32
    %c0_i32_0 = arith.constant 0 : i32
    return %arg0, %c0_i32 : i32, i32
  }
  func.func @transform_1(%arg0: i32) -> (i32, i32) {
    %c0_i32 = arith.constant 0 : i32
    %c0_i32_0 = arith.constant 0 : i32
    %c0_i32_1 = arith.constant 0 : i32
    return %c0_i32, %c0_i32_0 : i32, i32
  }
  func.func @transform_2(%arg0: i32) -> (i32, i32) {
    %c0_i32 = arith.constant 0 : i32
    %c0_i32_0 = arith.constant 0 : i32
    %c0_i32_1 = arith.constant 0 : i32
    return %c0_i32, %c0_i32_0 : i32, i32
  }
  func.func @transform_3(%arg0: i32) -> (i32, i32) {
    %c0_i32 = arith.constant 0 : i32
    %c0_i32_0 = arith.constant 0 : i32
    %c0_i32_1 = arith.constant 0 : i32
    return %c0_i32, %c0_i32_0 : i32, i32
  }
  func.func @transform_4(%arg0: i32) -> (i32, i32) {
    %c0_i32 = arith.constant 0 : i32
    %c0_i32_0 = arith.constant 0 : i32
    %c0_i32_1 = arith.constant 0 : i32
    return %c0_i32, %c0_i32_0 : i32, i32
  }
  func.func @transform_5(%arg0: i32) -> (i32, i32) {
    %c0_i32 = arith.constant 0 : i32
    %c0_i32_0 = arith.constant 0 : i32
    return %arg0, %c0_i32 : i32, i32
  }
}

</mosaic_0001>

<bundles_post_ra>
// kernel: tpu_custom_call.1
= control target key start
LH: loop header
LB: loop body
LE: loop exit
PB: predicated region body
PF: predicated region fallthrough
CT: control target
= control target key end

     0   :  { %s630_s18 = smov 0   ;;  %s688_s0 = inlined_call_operand.vmem [shape: f32[256,32], index: 0, kind: input, shape index: {}]   ;;  %s689_s1 = inlined_call_operand.vmem [shape: bf16[32,32], index: 1, kind: input, shape index: {}]   ;;  %s690_s2 = inlined_call_operand.vmem [shape: f32[1,32], index: 2, kind: input, shape index: {}]   ;;  %s691_s3 = inlined_call_operand.vmem [shape: bf16[32,8], index: 3, kind: input, shape index: {}]   ;;  %s692_s4 = inlined_call_operand.vmem [shape: f32[1,8], index: 4, kind: input, shape index: {}]   ;;  %s693_s5 = inlined_call_operand.vmem [shape: f32[256,8], index: 5, kind: output, shape index: {}]  }
   0x1 LB: > { %s519_s19 = sadd.s32 4294967295, %s598_s18   ;;  %p523_p0 = scmp.ge.s32.totalorder %s598_s18, 1  ;;  %s598_s18 = sphi %s630_s18, %s15_s18  }
   0x2   : > { %p188_p1 = scmp.lt.s32.totalorder %s598_s18, 5 }
   0x4   : > { %p189_p2 = pnand %p523_p0, %p188_p1 }
   0x5   : > { %s524_s22 = sshll.u32 (!%p189_p2), %s519_s19, 3 }
   0x6   : > { %192 = sbr.rel (%p189_p2) target bundleno = 436 (0x1b4), region = 40  ;;  %p217_p3 = scmp.lt.s32.totalorder (!%p189_p2), %s524_s22, 31 }
   0xb   : > { %v588_v0 = vld [vmem:[%s689_s1 + $0x8] sm:$0xff]   ;;  %v589_v1 = vld [vmem:[%s689_s1] sm:$0xff]   ;;  %s695_s22 = smov (!%p217_p3, %s524_s22), 31  ;;  %vm264_vm0 = vcmask 261120   ;;  %vm454_vm1 = vcmask 64512  }
   0xc   : > { %556 = vmatprep.subr.bf16.mxu0 %v588_v0  ;;  %s525_s25 = sshll.u32 %s695_s22, 3  ;;  %v590_v14 = vld [vmem:[%s691_s3 + $0x8] sm:$0xff]   ;;  %v591_v15 = vld [vmem:[%s691_s3] sm:$0xff]  }
   0xd   : > { %557 = vmatpush3.bf16.msra.mxu0 %v588_v0  ;;  %s220_s28 = scalar_lea.vmem %s688_s0, %s525_s25  ;;  %568 = vmatprep.subr.bf16.mxu1 %v590_v14  ;;  %v528_v18 = vld [vmem:[%s690_s2] ss:$0 sm:$0xff]  ;;  %s226_s14 = scalar_lea.vmem %s693_s5, %s525_s25 }
   0xe   : > { %558 = vmatprep.subr.bf16.mxu0 %v589_v1  ;;  %v229_v2 = vld [vmem:[%s220_s28] sm:$0xff]  ;;  %v230_v3 = vld [vmem:[%s220_s28 + $0x8] sm:$0xff]  ;;  %v231_v4 = vld [vmem:[%s220_s28 + $0x10] sm:$0xff]  ;;  %569 = vmatpush3.bf16.msra.mxu1 %v590_v14 }
   0xf   : > { %v237_v5 = vpack.c.bf16 %v230_v3, %v229_v2  ;;  %v232_v6 = vld [vmem:[%s220_s28 + $0x18] sm:$0xff]  ;;  %v233_v7 = vld [vmem:[%s220_s28 + $0x20] sm:$0xff]  ;;  %v234_v8 = vld [vmem:[%s220_s28 + $0x28] sm:$0xff]  ;;  %570 = vmatprep.subr.bf16.mxu1 %v591_v15 }
  0x10   : > { %v238_v9 = vpack.c.bf16 %v232_v6, %v231_v4  ;;  %v239_v10 = vpack.c.bf16 %v234_v8, %v233_v7  ;;  %v235_v11 = vld [vmem:[%s220_s28 + $0x30] sm:$0xff]  ;;  %v236_v12 = vld [vmem:[%s220_s28 + $0x38] sm:$0xff]  ;;  %v535_v45 = vld [vmem:[%s692_s4] ss:$0 sm:$0xff] }
  0x11   : > { %559 = vmatpush3.bf16.msra.mxu0 %v589_v1  ;;  %560 = vmatprep.mubr.msk.bf16.mxu0 %vm264_vm0, %v237_v5  ;;  %v240_v13 = vpack.c.bf16 %v236_v12, %v235_v11 }
  0x12   : > { %571 = vmatpush3.bf16.msra.mxu1 %v591_v15 }
  0x14   : > { %561 = vmatmul.mubr.msk.bf16.vlgmr.msra.gmra.mxu0 %vm264_vm0, %v238_v9 }
  0x15   : > { %564 = vmatprep.mubr.msk.bf16.mxu0 %vm264_vm0, %v239_v10 }
  0x1c   : > { %565 = vmatmul.mubr.msk.bf16.gmra.mxu0 %vm264_vm0, %v240_v13 }
  0xd4   : > { %v562_v16 = vpop.f32.mrf.mxu0 }
  0xd5   : > { %v320_v22 = vadd.f32 %v562_v16, %v528_v18 }
  0xd6   : > { %v311_v17 = vpop.f32.mrf.mxu0 }
  0xd7   : > { %v312_v20 = vadd.f32 %v528_v18, %v311_v17  ;;  %v344_v29 = vmax.f32 %v320_v22, 0.0 }
  0xd8   : > { %v563_v19 = vpop.f32.mrf.mxu0 }
  0xd9   : > { %v323_v21 = vadd.f32 %v563_v19, %v528_v18  ;;  %v342_v27 = vmax.f32 %v312_v20, 0.0 }
  0xda   : > { %v314_v23 = vpop.f32.mrf.mxu0 }
  0xdb   : > { %v315_v24 = vadd.f32 %v528_v18, %v314_v23  ;;  %v345_v25 = vmax.f32 %v323_v21, 0.0 }
  0xdc   : > { %v566_v26 = vpop.f32.mrf.mxu0 }
  0xdd   : > { %v343_v28 = vmax.f32 %v315_v24, 0.0  ;;  %v351_v32 = vpack.c.bf16 %v345_v25, %v344_v29  ;;  %v336_v36 = vadd.f32 %v566_v26, %v528_v18 }
  0xde   : > { %v327_v30 = vpop.f32.mrf.mxu0 }
  0xdf   : > { %v350_v31 = vpack.c.bf16 %v343_v28, %v342_v27  ;;  %v328_v34 = vadd.f32 %v528_v18, %v327_v30  ;;  %v348_v42 = vmax.f32 %v336_v36, 0.0 }
  0xe0   : > { %v567_v33 = vpop.f32.mrf.mxu0 }
  0xe1   : > { %v339_v35 = vadd.f32 %v567_v33, %v528_v18  ;;  %572 = vmatprep.mubr.msk.bf16.mxu1 %vm264_vm0, %v350_v31  ;;  %v346_v40 = vmax.f32 %v328_v34, 0.0 }
  0xe2   : > { %v330_v37 = vpop.f32.mrf.mxu0  ;;  %573 = vmatmul.mubr.msk.bf16.vlgmr.msra.gmra.mxu1 %vm264_vm0, %v351_v32 }
  0xe3   : > { %v331_v38 = vadd.f32 %v528_v18, %v330_v37  ;;  %v349_v39 = vmax.f32 %v339_v35, 0.0 }
  0xe5   : > { %v347_v41 = vmax.f32 %v331_v38, 0.0  ;;  %v353_v44 = vpack.c.bf16 %v349_v39, %v348_v42 }
  0xe7   : > { %v352_v43 = vpack.c.bf16 %v347_v41, %v346_v40 }
  0xe9   : > { %576 = vmatprep.mubr.msk.bf16.mxu1 %vm264_vm0, %v352_v43 }
  0xea   : > { %577 = vmatmul.mubr.msk.bf16.gmra.mxu1 %vm264_vm0, %v353_v44 }
 0x1a2   : > { %v574_v46 = vpop.f32.mrf.mxu1 }
 0x1a3   : > { %v432_v47 = vadd.f32 %v574_v46, %v535_v45 }
 0x1a4   : > { %v423_v48 = vpop.f32.mrf.mxu1 }
 0x1a5   : > { %457 = vst.msk [vmem:[%s226_s14 + $0x10] sm:$0xff] %vm454_vm1, %v432_v47  ;;  %v424_v49 = vadd.f32 %v535_v45, %v423_v48 }
 0x1a6   : > { %v575_v50 = vpop.f32.mrf.mxu1 }
 0x1a7   : > { %455 = vst.msk [vmem:[%s226_s14] sm:$0xff] %vm454_vm1, %v424_v49  ;;  %v435_v51 = vadd.f32 %v575_v50, %v535_v45 }
 0x1a8   : > { %v426_v52 = vpop.f32.mrf.mxu1 }
 0x1a9   : > { %458 = vst.msk [vmem:[%s226_s14 + $0x18] sm:$0xff] %vm454_vm1, %v435_v51  ;;  %v427_v53 = vadd.f32 %v535_v45, %v426_v52 }
 0x1aa   : > { %v578_v54 = vpop.f32.mrf.mxu1 }
 0x1ab   : > { %456 = vst.msk [vmem:[%s226_s14 + $0x8] sm:$0xff] %vm454_vm1, %v427_v53  ;;  %v448_v55 = vadd.f32 %v578_v54, %v535_v45 }
 0x1ac   : > { %v439_v56 = vpop.f32.mrf.mxu1 }
 0x1ad   : > { %461 = vst.msk [vmem:[%s226_s14 + $0x30] sm:$0xff] %vm454_vm1, %v448_v55  ;;  %v440_v57 = vadd.f32 %v535_v45, %v439_v56 }
 0x1ae   : > { %v579_v58 = vpop.f32.mrf.mxu1 }
 0x1af   : > { %459 = vst.msk [vmem:[%s226_s14 + $0x20] sm:$0xff] %vm454_vm1, %v440_v57  ;;  %v451_v59 = vadd.f32 %v579_v58, %v535_v45 }
 0x1b0   : > { %v442_v60 = vpop.f32.mrf.mxu1 }
 0x1b1   : > { %462 = vst.msk [vmem:[%s226_s14 + $0x38] sm:$0xff] %vm454_vm1, %v451_v59  ;;  %v443_v61 = vadd.f32 %v535_v45, %v442_v60 }
 0x1b3   : > { %460 = vst.msk [vmem:[%s226_s14 + $0x28] sm:$0xff] %vm454_vm1, %v443_v61 }
 0x1b4 PF: > { %s15_s18 = sadd.s32 1, %s598_s18  }
 0x1b5   : > { %p12_p4 = scmp.ge.s32.totalorder %s15_s18, 6  }
 0x1b7   :  { %14 = sbr.rel (!%p12_p4) target bundleno = 1 (0x1), region = 70 }

</bundles_post_ra>
